<compile_context>
chip_gen: v6e
topology: v6e:2x2x1
jax: 0.10.0
libtpu: 0.0.40
codegen_flags: <defaults>
</compile_context>

<pallas_src>
import jax
import jax.numpy as jnp
from jax.experimental import pallas as pl
from jax.experimental.pallas import tpu as pltpu

_LANES = 128
# Below this many bytes, the fixed launch overhead dominates: skip Pallas.
_PALLAS_MIN_BYTES = 1 << 20  # 1 MiB


def _copy_kernel(src_ref, dst_ref):
    # Whole-tile lane-dense pass-through (full-width unmasked stores).
    dst_ref[...] = src_ref[...]


def _sublane_multiple(dtype) -> int:
    # Sub-32-bit dtypes pack along sublanes: keep row counts aligned to the
    # packed sublane tile so loads/stores stay full-width.
    itemsize = jnp.dtype(dtype).itemsize
    return {4: 8, 2: 16, 1: 32}.get(itemsize, 8)


def _round_up(x: int, m: int) -> int:
    return ((x + m - 1) // m) * m


def _pallas_identity(flat: jnp.ndarray) -> jnp.ndarray:
    """Tiled, lane-dense identity copy of a flat 1-D array via Pallas."""
    total = flat.shape[0]
    dtype = flat.dtype
    itemsize = jnp.dtype(dtype).itemsize
    sub = _sublane_multiple(dtype)

    # ~2 MiB per tile: double-buffered input + output stays far below the
    # scoped-VMEM default on every generation (v5e 16 MiB is the tightest).
    target_block_rows = max(sub, (2 * 1024 * 1024) // (_LANES * itemsize))
    target_block_rows = _round_up(target_block_rows, sub)

    rows_needed = _round_up(pl.cdiv(total, _LANES), sub)
    block_rows = min(target_block_rows, rows_needed)
    rows = _round_up(rows_needed, block_rows)
    padded_total = rows * _LANES

    if padded_total != total:
        flat = jnp.pad(flat, (0, padded_total - total))
    slab = flat.reshape(rows, _LANES)

    out = pl.pallas_call(
        _copy_kernel,
        out_shape=jax.ShapeDtypeStruct((rows, _LANES), dtype),
        grid=(rows // block_rows,),
        in_specs=[pl.BlockSpec((block_rows, _LANES), lambda i: (i, 0))],
        out_specs=pl.BlockSpec((block_rows, _LANES), lambda i: (i, 0)),
        compiler_params=pltpu.CompilerParams(
            dimension_semantics=("parallel",)),
        cost_estimate=pl.CostEstimate(
            flops=0, transcendentals=0,
            bytes_accessed=2 * padded_total * itemsize),
    )(slab)

    out_flat = out.reshape(-1)
    if padded_total != total:
        out_flat = out_flat[:total]
    return out_flat


class Generator:
    """JAX/Pallas mirror of the (stub) PyTorch Generator module."""

    def __init__(self, board_shape, num_metrics):
        self.board_shape = tuple(board_shape)  # (C, H, W)
        self.num_metrics = num_metrics
        # The reference __init__ registers no parameters, so none are created.

    def __call__(self, noise: jnp.ndarray, metrics: jnp.ndarray,
                 *, force_pallas: bool = False):
        return self.forward(noise, metrics, force_pallas=force_pallas)

    def forward(self, noise: jnp.ndarray, metrics: jnp.ndarray,
                *, force_pallas: bool = False):
        del metrics  # unused by the stub forward
        b, c, h, w = noise.shape
        assert (c, h, w) == self.board_shape, "noise must match board_shape"

        total_bytes = noise.size * jnp.dtype(noise.dtype).itemsize
        if not force_pallas and total_bytes < _PALLAS_MIN_BYTES:
            # Fast path: the op is a literal identity; launching a kernel that
            # does zero compute would only add launch overhead plus a full
            # read+write HBM round trip.
            return noise

        out_flat = _pallas_identity(noise.reshape(-1))
        return out_flat.reshape(b, c, h, w)


if __name__ == "__main__":
    key = jax.random.PRNGKey(0)
    k_noise, k_metrics = jax.random.split(key)

    batch = 2
    board_shape = (4, 16, 16)   # (C, H, W)
    num_metrics = 8

    noise = jax.random.normal(k_noise, (batch, *board_shape), dtype=jnp.float32)
    metrics = jax.random.normal(k_metrics, (batch, num_metrics), dtype=jnp.float32)

    gen = Generator(board_shape, num_metrics)

    # Normal path (tiny tensor -> fast path, no Pallas launch).
    out_fast = jax.block_until_ready(gen(noise, metrics))
    assert out_fast.shape == noise.shape
    assert jnp.allclose(out_fast, noise)

    # Validate the Pallas path itself once (forced, same small input).
    out_pallas = jax.block_until_ready(gen(noise, metrics, force_pallas=True))
    assert out_pallas.shape == noise.shape
    assert jnp.allclose(out_pallas, noise)

    print("KERNEL_OK")
</pallas_src>

<mosaic_0001>
module attributes {stable_mosaic.version = 11 : i64} {
  func.func @_copy_kernel(%arg0: i32, %arg1: memref<16x128xf32, #tpu.memory_space<vmem>>, %arg2: memref<16x128xf32, #tpu.memory_space<vmem>>) attributes {dimension_semantics = [#tpu.dimension_semantics<parallel>], iteration_bounds = array<i64: 1>, scalar_prefetch = 0 : i64, scratch_operands = 0 : i64, tpu.core_type = #tpu.core_type<tc>, window_params = [{transform_indices = @transform_0, window_bounds = array<i64: 16, 128>}, {transform_indices = @transform_1, window_bounds = array<i64: 16, 128>}]} {
    %c0 = arith.constant 0 : index
    %c0_0 = arith.constant 0 : index
    %0 = vector.load %arg1[%c0, %c0_0] : memref<16x128xf32, #tpu.memory_space<vmem>>, vector<16x128xf32>
    %c0_1 = arith.constant 0 : index
    %c0_2 = arith.constant 0 : index
    %1 = vector.load %arg2[%c0_1, %c0_2] : memref<16x128xf32, #tpu.memory_space<vmem>>, vector<16x128xf32>
    tpu.vector_store %arg2[%c0_1, %c0_2], %0 {strides = array<i32>} : memref<16x128xf32, #tpu.memory_space<vmem>>, vector<16x128xf32>,
    return
  }
  func.func @transform_0(%arg0: i32) -> (i32, i32) {
    %c0_i32 = arith.constant 0 : i32
    %c0_i32_0 = arith.constant 0 : i32
    return %arg0, %c0_i32 : i32, i32
  }
  func.func @transform_1(%arg0: i32) -> (i32, i32) {
    %c0_i32 = arith.constant 0 : i32
    %c0_i32_0 = arith.constant 0 : i32
    return %arg0, %c0_i32 : i32, i32
  }
}

</mosaic_0001>

<bundles_post_ra>
// kernel: tpu_custom_call.1
= control target key start
LH: loop header
LB: loop body
LE: loop exit
PB: predicated region body
PF: predicated region fallthrough
CT: control target
= control target key end

     0   :  { %6 = vsyncpa [#allocation3], 0  ;;  %s112_s0 = inlined_call_operand.hbm [shape: f32[16,128], index: 0, kind: input, shape index: {}]   ;;  %s113_s1 = inlined_call_operand.hbm [shape: f32[16,128], index: 1, kind: output, shape index: {}]  }
   0x1   :  { %7 = vsyncpa [#allocation4], 0  ;;  %s92_s6 = smov [#allocation2]  }
   0x2   :  { %s13_s7 = sshll.u32 %s92_s6, 4  ;;  %s14_s7 = int_to_ptr.vmem [resolvable:$true] %s13_s7 }
   0x3   :  { %s56_s8 = scalar_lea.vmem %s14_s7, 256  ;;  %p61_p1 = scmp.lt.s32.totalorder %s14_s7, %s14_s7 }
   0x4   :  { %p57_p0 = scmp.ne.s32.totalorder %s14_s7, %s56_s8  ;;  %p62_p2 = scmp.lt.s32.totalorder %s56_s8, %s56_s8 }
   0x6   :  { %p63_p3 = por %p62_p2, %p61_p1 }
   0x8   :  { %p64_p4 = pnand %p63_p3, %p57_p0 }
   0xa   :  { %67 = shalt.err (!%p64_p4)
}
   0xb   :  { %s93_s9 = smov 128   ;;  %s94_s10 = smov 8  }
   0xc   :  { %19 = dma.hbm_to_vmem [thread:$0]  %s112_s0, 256, %s14_s7, [#allocation3], %s93_s9, %s93_s9, %s94_s10  }
   0xd   :  { %88 = dma.done.wait [#allocation3], 256  }
   0xe   :  { %89 = vsyncadd [#allocation3], 4294967040  ;;  %s95_s13 = smov [#allocation5]   ;;  %v23_v0 = vld [vmem:[#allocation2] sm:$0xff]  ;;  %v24_v1 = vld [vmem:[#allocation2 + $0x8] sm:$0xff] }
   0xf   :  { %s32_s14 = sshll.u32 %s95_s13, 4  ;;  %25 = vst [vmem:[#allocation5] sm:$0xff] %v23_v0  ;;  %26 = vst [vmem:[#allocation5 + $0x8] sm:$0xff] %v24_v1  ;;  %s33_s14 = int_to_ptr.vmem [resolvable:$true] %s32_s14 }
  0x10   :  { %s68_s15 = scalar_lea.vmem %s33_s14, 256  ;;  %p73_p6 = scmp.lt.s32.totalorder %s33_s14, %s33_s14 }
  0x11   :  { %p69_p5 = scmp.ne.s32.totalorder %s33_s14, %s68_s15  ;;  %p74_p7 = scmp.lt.s32.totalorder %s68_s15, %s68_s15 }
  0x13   :  { %p75_p8 = por %p74_p7, %p73_p6 }
  0x15   :  { %p76_p9 = pnand %p75_p8, %p69_p5 }
  0x17   :  { %79 = shalt.err (!%p76_p9)
}
  0x18   :  { %38 = dma.vmem_to_hbm [thread:$0]  %s33_s14, 256, %s113_s1, [#allocation4], %s93_s9, %s93_s9, %s94_s10  }
  0x19   :  { %90 = dma.done.wait [#allocation4], 256  }
  0x1a   :  { %91 = vsyncadd [#allocation4], 4294967040 }
  0x1b   :  { %42 = vsyncpa [#allocation3], 1 }
  0x1c   :  { %43 = vsyncpa [#allocation4], 1 }

</bundles_post_ra>
